<compile_context>
chip_gen: v5e
topology: v5e:2x2
jax: 0.10.0
libtpu: 0.0.40
codegen_flags: <defaults>
</compile_context>

<pallas_src>
import functools

import jax
import jax.numpy as jnp
import numpy as np
from jax import lax
from jax.experimental import pallas as pl
from jax.experimental.pallas import tpu as pltpu


def _fc_block_kernel(leaky_slope, eps, fuse_bn_act,
                     x_ref, w_ref, b_ref, g_ref, beta_ref,
                     out_ref, acc_ref):
    """One FC block tile.

    x_ref   : (N, bk)      activation tile (full batch, one K slice)
    w_ref   : (bk, bn)     weight tile (already transposed to Din x Dout)
    b_ref   : (1, bn)      Linear bias
    g_ref   : (1, bn)      BatchNorm gamma
    beta_ref: (1, bn)      BatchNorm beta
    out_ref : (N, bn)      output tile (resident across the reduction axis)
    acc_ref : (N, bn) f32  accumulator scratch
    """
    k = pl.program_id(1)

    @pl.when(k == 0)
    def _():
        acc_ref[...] = jnp.zeros_like(acc_ref)

    # Single fused MXU matmul per grid step, f32 accumulation.
    acc_ref[...] += jnp.dot(x_ref[...], w_ref[...],
                            preferred_element_type=jnp.float32)

    @pl.when(k == pl.num_programs(1) - 1)
    def _():
        y = acc_ref[...] + b_ref[...]                      # Linear bias
        if fuse_bn_act:
            # BatchNorm1d, training mode: biased variance over the batch axis,
            # single-pass statistics, folded into one scale/shift per feature.
            inv_n = 1.0 / y.shape[0]
            mu = jnp.sum(y, axis=0, keepdims=True) * inv_n           # E[y]
            ex2 = jnp.sum(y * y, axis=0, keepdims=True) * inv_n      # E[y^2]
            var = ex2 - mu * mu
            scale = g_ref[...] * lax.rsqrt(var + eps)
            shift = beta_ref[...] - mu * scale
            y = y * scale + shift
            # LeakyReLU(0 < slope < 1): one VPU max instead of compare+select.
            y = jnp.maximum(y, leaky_slope * y)
        out_ref[...] = y.astype(out_ref.dtype)


def _pick_block(dim, preferred):
    """Largest legal tile: 128-multiple if possible, else the full extent."""
    if dim % 128 == 0:
        return min(preferred, dim)
    return dim


def fc_block(x, w, b, gamma, beta, *, fuse_bn_act=True, leaky_slope=0.2,
             eps=1e-5, block_out=512, block_in=512, mxu_dtype=jnp.float32):
    """x: (N, Din); w: (Dout, Din) PyTorch layout; b/gamma/beta: (Dout,)."""
    N, Din = x.shape
    Dout = w.shape[0]

    bn = _pick_block(Dout, block_out)
    bk = _pick_block(Din, block_in)
    grid = (Dout // bn, Din // bk)

    wT = jnp.transpose(w).astype(mxu_dtype)                # (Din, Dout) MXU RHS
    xk = x.astype(mxu_dtype)
    b2 = b.reshape(1, Dout).astype(jnp.float32)
    g2 = gamma.reshape(1, Dout).astype(jnp.float32)
    bt2 = beta.reshape(1, Dout).astype(jnp.float32)

    kernel = functools.partial(_fc_block_kernel, leaky_slope, eps, fuse_bn_act)

    return pl.pallas_call(
        kernel,
        out_shape=jax.ShapeDtypeStruct((N, Dout), jnp.float32),
        grid_spec=pltpu.PrefetchScalarGridSpec(
            num_scalar_prefetch=0,
            grid=grid,
            in_specs=[
                pl.BlockSpec((N, bk), lambda i, k: (0, k)),    # activations
                pl.BlockSpec((bk, bn), lambda i, k: (k, i)),   # weights
                pl.BlockSpec((1, bn), lambda i, k: (0, i)),    # bias
                pl.BlockSpec((1, bn), lambda i, k: (0, i)),    # gamma
                pl.BlockSpec((1, bn), lambda i, k: (0, i)),    # beta
            ],
            out_specs=pl.BlockSpec((N, bn), lambda i, k: (0, i)),
            scratch_shapes=[pltpu.VMEM((N, bn), jnp.float32)],
        ),
        compiler_params=pltpu.CompilerParams(
            dimension_semantics=("parallel", "arbitrary")),
    )(xk, wT, b2, g2, bt2)


def fcg_forward(x, params, *, leaky_slope=0.2, eps=1e-5,
                mxu_dtype=jnp.float32):
    """FCG forward. params: list of (W, b, gamma, beta); the last entry is the
    plain output Linear (its gamma/beta are ignored)."""
    h = x
    n_layers = len(params)
    for idx, (w, b, g, beta) in enumerate(params):
        h = fc_block(h, w, b, g, beta,
                     fuse_bn_act=(idx < n_layers - 1),
                     leaky_slope=leaky_slope, eps=eps, mxu_dtype=mxu_dtype)
    return h


def _reference(x, params, *, leaky_slope=0.2, eps=1e-5):
    """Pure-JAX reference matching PyTorch semantics (training-mode BN)."""
    h = x
    n = len(params)
    for idx, (w, b, g, beta) in enumerate(params):
        y = h @ w.T + b
        if idx < n - 1:
            mu = jnp.mean(y, axis=0, keepdims=True)
            var = jnp.mean((y - mu) ** 2, axis=0, keepdims=True)   # biased
            y = (y - mu) / jnp.sqrt(var + eps) * g + beta
            y = jnp.where(y >= 0, y, leaky_slope * y)
        h = y
    return h


if __name__ == "__main__":
    # Small shapes consistent with the module: batch=8, input_dim=128,
    # output_dim=128; internal dims are fixed by FCG:
    # 4096 -> 1024 -> 512 -> 256(latent) -> 512 -> 1024 -> 4096 -> output.
    N, input_dim, output_dim, latent_dim = 8, 128, 128, 256
    dims = [input_dim, 4096, 1024, 512, latent_dim, 512, 1024, 4096, output_dim]

    key = jax.random.PRNGKey(0)
    key, kx = jax.random.split(key)
    x = jax.random.normal(kx, (N, input_dim), dtype=jnp.float32)

    params = []
    for li in range(len(dims) - 1):
        din, dout = dims[li], dims[li + 1]
        key, kw, kb, kg, kbt = jax.random.split(key, 5)
        w = jax.random.normal(kw, (dout, din), jnp.float32) / np.sqrt(din)
        b = 0.05 * jax.random.normal(kb, (dout,), jnp.float32)
        if li < len(dims) - 2:          # FCBlock layers: BN affine params
            g = 1.0 + 0.1 * jax.random.normal(kg, (dout,), jnp.float32)
            bt = 0.1 * jax.random.normal(kbt, (dout,), jnp.float32)
        else:                            # final plain Linear: dummies (unused)
            g = jnp.ones((dout,), jnp.float32)
            bt = jnp.zeros((dout,), jnp.float32)
        params.append((w, b, g, bt))

    # TODO(synk): BatchNorm1d running-mean/var (momentum) buffer updates are not
    # modeled; the forward pass uses training-mode batch statistics as PyTorch does.
    out = fcg_forward(x, params)
    out = jax.block_until_ready(out)

    ref = _reference(x, params)
    np.testing.assert_allclose(np.asarray(out), np.asarray(ref),
                               rtol=5e-3, atol=5e-3)
    assert out.shape == (N, output_dim)

    print("KERNEL_OK")
</pallas_src>

<mosaic_0001>
module attributes {stable_mosaic.version = 11 : i64} {
  func.func @_fc_block_kernel(%arg0: i32, %arg1: i32, %arg2: memref<8x128xf32, #tpu.memory_space<vmem>>, %arg3: memref<128x512xf32, #tpu.memory_space<vmem>>, %arg4: memref<1x512xf32, #tpu.memory_space<vmem>>, %arg5: memref<1x512xf32, #tpu.memory_space<vmem>>, %arg6: memref<1x512xf32, #tpu.memory_space<vmem>>, %arg7: memref<8x512xf32, #tpu.memory_space<vmem>>, %arg8: memref<8x512xf32, #tpu.memory_space<vmem>>) attributes {dimension_semantics = [#tpu.dimension_semantics<parallel>, #tpu.dimension_semantics<arbitrary>], iteration_bounds = array<i64: 8, 1>, scalar_prefetch = 0 : i64, scratch_operands = 1 : i64, tpu.core_type = #tpu.core_type<tc>, window_params = [{transform_indices = @transform_0, window_bounds = array<i64: 8, 128>}, {transform_indices = @transform_1, window_bounds = array<i64: 128, 512>}, {transform_indices = @transform_2, window_bounds = array<i64: 1, 512>}, {transform_indices = @transform_3, window_bounds = array<i64: 1, 512>}, {transform_indices = @transform_4, window_bounds = array<i64: 1, 512>}, {transform_indices = @transform_5, window_bounds = array<i64: 8, 512>}]} {
    %c0_i32 = arith.constant 0 : i32
    %0 = arith.cmpi eq, %arg1, %c0_i32 : i32
    %1 = arith.extui %0 : i1 to i32
    %c0_i32_0 = arith.constant 0 : i32
    %2 = arith.cmpi ne, %1, %c0_i32_0 : i32
    scf.if %2 {
      %cst_10 = arith.constant 0.000000e+00 : f32
      %12 = vector.broadcast %cst_10 : f32 to vector<8x512xf32>
      %c0_11 = arith.constant 0 : index
      %c0_12 = arith.constant 0 : index
      %13 = vector.load %arg8[%c0_11, %c0_12] : memref<8x512xf32, #tpu.memory_space<vmem>>, vector<8x512xf32>
      tpu.vector_store %arg8[%c0_11, %c0_12], %12 {strides = array<i32>} : memref<8x512xf32, #tpu.memory_space<vmem>>, vector<8x512xf32>,
    } else {
    }
    %c0 = arith.constant 0 : index
    %c0_1 = arith.constant 0 : index
    %3 = vector.load %arg8[%c0, %c0_1] : memref<8x512xf32, #tpu.memory_space<vmem>>, vector<8x512xf32>
    %c0_2 = arith.constant 0 : index
    %c0_3 = arith.constant 0 : index
    %4 = vector.load %arg2[%c0_2, %c0_3] : memref<8x128xf32, #tpu.memory_space<vmem>>, vector<8x128xf32>
    %c0_4 = arith.constant 0 : index
    %c0_5 = arith.constant 0 : index
    %5 = vector.load %arg3[%c0_4, %c0_5] : memref<128x512xf32, #tpu.memory_space<vmem>>, vector<128x512xf32>
    %cst = arith.constant dense<0.000000e+00> : vector<8x512xf32>
    %6 = tpu.matmul %4, %5, %cst {dimension_numbers = #tpu.dot_dimension_numbers<[1], [0], [0], [1], [0, 0, 1, 1], [], []>} : vector<8x128xf32>, vector<128x512xf32>, vector<8x512xf32> -> vector<8x512xf32>
    %7 = arith.addf %3, %6 : vector<8x512xf32>
    %c0_6 = arith.constant 0 : index
    %c0_7 = arith.constant 0 : index
    %8 = vector.load %arg8[%c0_6, %c0_7] : memref<8x512xf32, #tpu.memory_space<vmem>>, vector<8x512xf32>
    tpu.vector_store %arg8[%c0_6, %c0_7], %7 {strides = array<i32>} : memref<8x512xf32, #tpu.memory_space<vmem>>, vector<8x512xf32>,
    %c0_i32_8 = arith.constant 0 : i32
    %9 = arith.cmpi eq, %arg1, %c0_i32_8 : i32
    %10 = arith.extui %9 : i1 to i32
    %c0_i32_9 = arith.constant 0 : i32
    %11 = arith.cmpi ne, %10, %c0_i32_9 : i32
    scf.if %11 {
      %c0_10 = arith.constant 0 : index
      %c0_11 = arith.constant 0 : index
      %12 = vector.load %arg8[%c0_10, %c0_11] : memref<8x512xf32, #tpu.memory_space<vmem>>, vector<8x512xf32>
      %c0_12 = arith.constant 0 : index
      %c0_13 = arith.constant 0 : index
      %13 = vector.load %arg4[%c0_12, %c0_13] : memref<1x512xf32, #tpu.memory_space<vmem>>, vector<1x512xf32>
      %14 = vector.broadcast %13 : vector<1x512xf32> to vector<8x512xf32>
      %15 = arith.addf %12, %14 : vector<8x512xf32>
      %cst_14 = arith.constant dense<0.000000e+00> : vector<512xf32>
      %16 = vector.multi_reduction <add>, %15, %cst_14 [0] : vector<8x512xf32> to vector<512xf32>
      %17 = vector.shape_cast %16 : vector<512xf32> to vector<1x512xf32>
      %cst_15 = arith.constant 1.250000e-01 : f32
      %18 = vector.broadcast %cst_15 : f32 to vector<1x512xf32>
      %19 = arith.mulf %17, %18 : vector<1x512xf32>
      %20 = arith.mulf %15, %15 : vector<8x512xf32>
      %cst_16 = arith.constant dense<0.000000e+00> : vector<512xf32>
      %21 = vector.multi_reduction <add>, %20, %cst_16 [0] : vector<8x512xf32> to vector<512xf32>
      %22 = vector.shape_cast %21 : vector<512xf32> to vector<1x512xf32>
      %cst_17 = arith.constant 1.250000e-01 : f32
      %23 = vector.broadcast %cst_17 : f32 to vector<1x512xf32>
      %24 = arith.mulf %22, %23 : vector<1x512xf32>
      %25 = arith.mulf %19, %19 : vector<1x512xf32>
      %26 = arith.subf %24, %25 : vector<1x512xf32>
      %c0_18 = arith.constant 0 : index
      %c0_19 = arith.constant 0 : index
      %27 = vector.load %arg5[%c0_18, %c0_19] : memref<1x512xf32, #tpu.memory_space<vmem>>, vector<1x512xf32>
      %cst_20 = arith.constant 9.99999974E-6 : f32
      %28 = vector.broadcast %cst_20 : f32 to vector<1x512xf32>
      %29 = arith.addf %26, %28 : vector<1x512xf32>
      %30 = math.rsqrt %29 : vector<1x512xf32>
      %31 = arith.mulf %27, %30 : vector<1x512xf32>
      %c0_21 = arith.constant 0 : index
      %c0_22 = arith.constant 0 : index
      %32 = vector.load %arg6[%c0_21, %c0_22] : memref<1x512xf32, #tpu.memory_space<vmem>>, vector<1x512xf32>
      %33 = arith.mulf %19, %31 : vector<1x512xf32>
      %34 = arith.subf %32, %33 : vector<1x512xf32>
      %35 = vector.broadcast %31 : vector<1x512xf32> to vector<8x512xf32>
      %36 = arith.mulf %15, %35 : vector<8x512xf32>
      %37 = vector.broadcast %34 : vector<1x512xf32> to vector<8x512xf32>
      %38 = arith.addf %36, %37 : vector<8x512xf32>
      %cst_23 = arith.constant 2.000000e-01 : f32
      %39 = vector.broadcast %cst_23 : f32 to vector<8x512xf32>
      %40 = arith.mulf %39, %38 : vector<8x512xf32>
      %41 = arith.maximumf %38, %40 : vector<8x512xf32>
      %c0_24 = arith.constant 0 : index
      %c0_25 = arith.constant 0 : index
      %42 = vector.load %arg7[%c0_24, %c0_25] : memref<8x512xf32, #tpu.memory_space<vmem>>, vector<8x512xf32>
      tpu.vector_store %arg7[%c0_24, %c0_25], %41 {strides = array<i32>} : memref<8x512xf32, #tpu.memory_space<vmem>>, vector<8x512xf32>,
    } else {
    }
    return
  }
  func.func @transform_0(%arg0: i32, %arg1: i32) -> (i32, i32) {
    %c0_i32 = arith.constant 0 : i32
    %c0_i32_0 = arith.constant 0 : i32
    return %c0_i32, %arg1 : i32, i32
  }
  func.func @transform_1(%arg0: i32, %arg1: i32) -> (i32, i32) {
    %c0_i32 = arith.constant 0 : i32
    return %arg1, %arg0 : i32, i32
  }
  func.func @transform_2(%arg0: i32, %arg1: i32) -> (i32, i32) {
    %c0_i32 = arith.constant 0 : i32
    %c0_i32_0 = arith.constant 0 : i32
    return %c0_i32, %arg0 : i32, i32
  }
  func.func @transform_3(%arg0: i32, %arg1: i32) -> (i32, i32) {
    %c0_i32 = arith.constant 0 : i32
    %c0_i32_0 = arith.constant 0 : i32
    return %c0_i32, %arg0 : i32, i32
  }
  func.func @transform_4(%arg0: i32, %arg1: i32) -> (i32, i32) {
    %c0_i32 = arith.constant 0 : i32
    %c0_i32_0 = arith.constant 0 : i32
    return %c0_i32, %arg0 : i32, i32
  }
  func.func @transform_5(%arg0: i32, %arg1: i32) -> (i32, i32) {
    %c0_i32 = arith.constant 0 : i32
    %c0_i32_0 = arith.constant 0 : i32
    return %c0_i32, %arg0 : i32, i32
  }
}

</mosaic_0001>

<bundles_post_ra>
// kernel: tpu_custom_call.1
= control target key start
LH: loop header
LB: loop body
LE: loop exit
PB: predicated region body
PF: predicated region fallthrough
CT: control target
= control target key end

     0   :  { %s1673_s0 = inlined_call_operand.hbm [shape: f32[8,128], index: 0, kind: input, shape index: {}]   ;;  %s1674_s1 = inlined_call_operand.hbm [shape: f32[128,4096], index: 1, kind: input, shape index: {}]   ;;  %s1675_s2 = inlined_call_operand.hbm [shape: f32[1,4096], index: 2, kind: input, shape index: {}]   ;;  %s1676_s3 = inlined_call_operand.hbm [shape: f32[1,4096], index: 3, kind: input, shape index: {}]   ;;  %s1677_s4 = inlined_call_operand.hbm [shape: f32[1,4096], index: 4, kind: input, shape index: {}]   ;;  %s1678_s5 = inlined_call_operand.hbm [shape: f32[8,4096], index: 5, kind: output, shape index: {}]  }
   0x1   :  { %1681 = sst [smem:[#allocation20_spill]] %s1673_s0 }
   0x2   :  { %1682 = sst [smem:[#allocation21_spill]] %s1674_s1 }
   0x3   :  { %1683 = sst [smem:[#allocation22_spill]] %s1676_s3 }
   0x4   :  { %10 = vsyncpa [#allocation4], 0 }
   0x5   :  { %11 = vsyncpa [#allocation7], 0 }
   0x6   :  { %13 = vsyncpa [#allocation7 + $0x1], 0 }
   0x7   :  { %14 = vsyncpa [#allocation10], 0 }
   0x8   :  { %16 = vsyncpa [#allocation10 + $0x1], 0 }
   0x9   :  { %17 = vsyncpa [#allocation5], 0 }
   0xa   :  { %19 = vsyncpa [#allocation5 + $0x1], 0  ;;  %s1348_s18 = smov 0   ;;  %s1350_s19 = smov 0  }
   0xb   :  { %s1352_s20 = smov 0   ;;  %s1354_s21 = smov 0  }
   0xc   :  { %s1356_s22 = smov 0   ;;  %s1358_s23 = smov 0  }
   0xd LB: > { %1684 = sst [smem:[#allocation17_spill]] %s1308_s22  ;;  %s37_s24 = sadd.s32 1, %s1308_s22  ;;  %s1312_s23 = sphi %s1358_s23, %s25_s23   ;;  %s1308_s22 = sphi %s1356_s22, %s1698_s22   ;;  %s1304_s21 = sphi %s1354_s21, %s1697_s21   ;;  %s1300_s20 = sphi %s1352_s20, %s1701_s20   ;;  %s1296_s19 = sphi %s1350_s19, %s1700_s19   ;;  %s1292_s18 = sphi %s1348_s18, %s1699_s18  }
   0xe   : > { %s72_s25 = sadd.s32 1, %s1300_s20  ;;  %p39_p0 = scmp.ge.s32.totalorder %s37_s24, 8 }
   0xf   : > { %p79_p1 = scmp.ne.s32.totalorder %s1300_s20, %s1296_s19  ;;  %p80_p2 = scmp.eq.s32.totalorder %s1312_s23, 0 }
  0x10   : > { %s1703_s24 = smov (%p39_p0, %s37_s24), 0  ;;  %p1009_p4 = scmp.lt.s32.totalorder %s1312_s23, 8 }
  0x11   : > { %1685 = sst [smem:[#allocation18_spill]] %s1703_s24  ;;  %p1388_p3 = por %p80_p2, %p79_p1 }
  0x12   : > { %s68_s27 = ssub.s32 %s1308_s22, %s1703_s24  ;;  %s227_s28 = sand.u32 1, %s1312_s23  }
  0x13   : > { %p70_p5 = scmp.eq.s32.totalorder %s68_s27, 0  ;;  %s229_s29 = sand.u32 1, %s1300_s20  }
  0x14   : > { %s971_s30 = sshll.u32 %s1308_s22, 5  ;;  %s950_s7 = sshll.u32 %s229_s29, 9 }
  0x15   : > { %s1399_s6 = scalar_select %p70_p5, %s1300_s20, %s72_s25  }
  0x16   : > { %s1688_s1 = sld [smem:[#allocation21_spill]]  ;;  %s231_s12 = scalar_lea.vmem [#allocation6], %s950_s7 }
  0x17   : > { %1687 = sst [smem:[#allocation19_spill]] %s1399_s6  ;;  %s242_s13 = sshll.u32 %s231_s12, 4  ;;  %s243_s13 = int_to_ptr.vmem [resolvable:$true] %s242_s13 }
  0x18   : > { %p1408_p6 = pnand %p1009_p4, %p1388_p3  ;;  %s1412_s15 = scalar_lea.sflag [#allocation7], %s227_s28 }
  0x19   : > { %s1314_s16 = smov 4096   ;;  %s1315_s17 = smov 512  }
  0x1a   : > { %s1316_s25 = smov 32   ;;  %s1417_s26 = sshll.u32 %s229_s29, 2 }
  0x1b   : > { %s1420_s27 = sshll.u32 %s1308_s22, 2  ;;  %s1690_s3 = sld [smem:[#allocation22_spill]] }
  0x1c   : > { %s239_s10 = scalar_lea.hbm %s1688_s1, %s971_s30  ;;  %s275_s9 = scalar_lea.vmem [#allocation9], %s1417_s26 }
  0x1d   : > { %s240_s11 = sshll.u32 %s239_s10, 4  ;;  %s283_s10 = sshll.u32 %s275_s9, 4  ;;  %s241_s11 = int_to_ptr.hbm [resolvable:$true] %s240_s11  ;;  %s284_s10 = int_to_ptr.vmem [resolvable:$true] %s283_s10 }
  0x1e   : > { %994 = dma.hbm_to_vmem [thread:$0]  (!%p1408_p6), %s241_s11, 8192, %s243_s13, %s1412_s15, %s1314_s16, %s1315_s17, %s1316_s25  }
  0x1f   : > { %s1427_s11 = scalar_lea.sflag [#allocation10], %s227_s28  ;;  %s1433_s29 = sadd.s32 4294967295, %s1312_s23  }
  0x20   : > { %s946_s13 = sadd.s32 4294967294, %s1312_s23   ;;  %p85_p7 = scmp.ne.s32.totalorder %s1296_s19, %s1292_s18 }
  0x21   : > { %s279_s8 = scalar_lea.hbm %s1690_s3, %s1420_s27  ;;  %p86_p8 = scmp.eq.s32.totalorder %s1433_s29, 0 }
  0x22   : > { %s281_s12 = sshll.u32 %s279_s8, 4  ;;  %p187_p9 = scmp.eq.s32.totalorder %s1433_s29, 7  ;;  %s282_s12 = int_to_ptr.hbm [resolvable:$true] %s281_s12 }
  0x23   : > { %1000 = dma.hbm_to_vmem [thread:$0]  (!%p1408_p6), %s282_s12, 64, %s284_s10, %s1427_s11  }
  0x24   : > { %p193_p10 = scmp.eq.s32.totalorder %s946_s13, 7  ;;  %p947_p11 = scmp.ge.s32.totalorder %s1312_s23, 1 }
  0x25   : > { %p1443_p12 = por %p86_p8, %p85_p7  ;;  %p1450_p13 = por %p187_p9, %p79_p1 }
  0x26   : > { %p1454_p0 = por %p193_p10, %p85_p7  ;;  %p200_p2 = scmp.lt.s32.totalorder %s1312_s23, 9 }
  0x27   : > { %s1694_s0 = sld [smem:[#allocation20_spill]]  ;;  %s1317_s9 = smov [#allocation3]  }
  0x28   : > { %p1462_p3 = pnand %p947_p11, %p200_p2  ;;  %s216_s10 = sshll.u32 %s1317_s9, 4  ;;  %s217_s10 = int_to_ptr.vmem [resolvable:$true] %s216_s10 }
  0x29   : > { %s260_s25 = scalar_lea.hbm %s1675_s2, %s1420_s27  ;;  %s298_s9 = scalar_lea.hbm %s1677_s4, %s1420_s27 }
  0x2a   : > { %p987_p1 = pneg %p1462_p3  ;;  %s262_s30 = sshll.u32 %s260_s25, 4  ;;  %s263_s30 = int_to_ptr.hbm [resolvable:$true] %s262_s30 }
  0x2b   : > { %s300_s22 = sshll.u32 %s298_s9, 4  ;;  %s294_s6 = scalar_lea.vmem [#allocation11], %s1417_s26  ;;  %s301_s22 = int_to_ptr.hbm [resolvable:$true] %s300_s22 }
  0x2c   : > { %p988_p4 = pnand %p987_p1, %p86_p8  ;;  %s302_s12 = sshll.u32 %s294_s6, 4  ;;  %s303_s12 = int_to_ptr.vmem [resolvable:$true] %s302_s12 }
  0x2d   : > { %s214_s7 = sshll.u32 %s1694_s0, 4  ;;  %s256_s0 = scalar_lea.vmem [#allocation8], %s1417_s26  ;;  %s215_s7 = int_to_ptr.hbm [resolvable:$true] %s214_s7 }
  0x2e   : > { %s264_s1 = sshll.u32 %s256_s0, 4  ;;  %311 = sbr.rel (%p1462_p3) target bundleno = 296 (0x128), region = 40  ;;  %s265_s1 = int_to_ptr.vmem [resolvable:$true] %s264_s1 }
  0x2f   : > { %990 = dma.hbm_to_vmem [thread:$0]  (!%p988_p4), %s215_s7, 128, %s217_s10, [#allocation4]  }
  0x30   : > { %997 = dma.hbm_to_vmem [thread:$0]  (!%p1408_p6), %s263_s30, 64, %s265_s1, %s1412_s15  }
  0x31   : > { %1003 = dma.hbm_to_vmem [thread:$0]  (!%p1408_p6), %s301_s22, 64, %s303_s12, %s1427_s11  }
  0x33   : > { %1275 = dma.done.wait (%p86_p8), [#allocation4], 128  }
  0x34   : > { %1277 = vsyncadd (%p86_p8), [#allocation4], 4294967168  ;;  %s318_s0 = sand.u32 1, %s1433_s29   ;;  %s1494_s1 = sand.u32 1, %s1296_s19  }
  0x35   : > { %s961_s3 = sshll.u32 %s1494_s1, 9  ;;  %s319_s24 = scalar_lea.sflag [#allocation7], %s318_s0 }
  0x36   : > { %s1497_s6 = scalar_lea.vmem [#allocation6], %s961_s3 }
  0x37   : > { %1279 = dma.done.wait (%p1443_p12), %s319_s24, 8256  }
  0x38   : > { %1281 = vsyncadd (%p1443_p12), %s319_s24, 4294959040  ;;  %s1504_s22 = sshll.u32 %s1494_s1, 2  ;;  %s339_s15 = scalar_lea.sflag [#allocation10], %s318_s0 }
  0x39   : > { %s332_s14 = scalar_lea.vmem [#allocation8], %s1504_s22  ;;  %s342_s26 = scalar_lea.vmem [#allocation9], %s1504_s22 }
  0x3a   : > { %1283 = dma.done.wait (%p1443_p12), %s339_s15, 128  }
  0x3b   : > { %1285 = vsyncadd (%p1443_p12), %s339_s15, 4294967168  ;;  %v474_v0 = vld [vmem:[%s1497_s6 + $0x1e0] sm:$0xff]  ;;  %v475_v1 = vld [vmem:[%s1497_s6 + $0x1e8] sm:$0xff]  ;;  %vm707_vm10 = vcmask 1040384   ;;  %vm709_vm12 = vcmask 1042434   ;;  %vm711_vm14 = vcmask 1041408  }
  0x3c   : > { %v476_v2 = vld [vmem:[%s1497_s6 + $0x1f0] sm:$0xff]  ;;  %478 = vmatpush.msra.mxu0 %v474_v0  ;;  %498 = vmatpush.msra.mxu1 %v475_v1  ;;  %v477_v3 = vld [vmem:[%s1497_s6 + $0x1f8] sm:$0xff]  ;;  %v470_v4 = vld [vmem:[%s1497_s6 + $0x1c0] sm:$0xff]  ;;  %s352_s27 = scalar_lea.vmem [#allocation11], %s1504_s22  ;;  %s965_s11 = sshll.u32 %s1494_s1, 5 }
  0x3d   : > { %v471_v5 = vld [vmem:[%s1497_s6 + $0x1c8] sm:$0xff]  ;;  %518 = vmatpush.msra.mxu2 %v476_v2  ;;  %538 = vmatpush.msra.mxu3 %v477_v3  ;;  %v472_v6 = vld [vmem:[%s1497_s6 + $0x1d0] sm:$0xff]  ;;  %v473_v7 = vld [vmem:[%s1497_s6 + $0x1d8] sm:$0xff]  ;;  %s972_s29 = sshll.u32 %s1304_s21, 5  ;;  %s394_s10 = scalar_lea.vmem [#allocation12], %s965_s11 }
  0x3e   : > { %v466_v8 = vld [vmem:[%s1497_s6 + $0x1a0] sm:$0xff]  ;;  %479 = vmatpush.msra.mxu0 %v470_v4  ;;  %499 = vmatpush.msra.mxu1 %v471_v5  ;;  %v467_v9 = vld [vmem:[%s1497_s6 + $0x1a8] sm:$0xff]  ;;  %v468_v10 = vld [vmem:[%s1497_s6 + $0x1b0] sm:$0xff]  ;;  %s782_s8 = scalar_lea.hbm %s1678_s5, %s972_s29  ;;  %s784_s13 = sshll.u32 %s394_s10, 4  ;;  %s785_s13 = int_to_ptr.vmem [resolvable:$true] %s784_s13 }
  0x3f   : > { %v469_v11 = vld [vmem:[%s1497_s6 + $0x1b8] sm:$0xff]  ;;  %519 = vmatpush.msra.mxu2 %v472_v6  ;;  %539 = vmatpush.msra.mxu3 %v473_v7  ;;  %v462_v12 = vld [vmem:[%s1497_s6 + $0x180] sm:$0xff]  ;;  %v463_v13 = vld [vmem:[%s1497_s6 + $0x188] sm:$0xff]  ;;  %s786_s25 = sshll.u32 %s782_s8, 4  ;;  %s771_s21 = scalar_lea.sflag [#allocation5], %s1494_s1  ;;  %s787_s25 = int_to_ptr.hbm [resolvable:$true] %s786_s25 }
  0x40   : > { %480 = vmatpush.msra.mxu0 %v466_v8  ;;  %500 = vmatpush.msra.mxu1 %v467_v9  ;;  %v464_v14 = vld [vmem:[%s1497_s6 + $0x190] sm:$0xff]  ;;  %v465_v15 = vld [vmem:[%s1497_s6 + $0x198] sm:$0xff]  ;;  %v458_v16 = vld [vmem:[%s1497_s6 + $0x160] sm:$0xff]  ;;  %s1236_s30 = sshra.s32 %s787_s25, 4  ;;  %s1242_s3 = scalar_lea.hbm %s1678_s5, 256  ;;  %s1237_s30 = int_to_ptr.hbm [resolvable:$true] %s1236_s30 }
  0x41   : > { %520 = vmatpush.msra.mxu2 %v468_v10  ;;  %540 = vmatpush.msra.mxu3 %v469_v11  ;;  %v459_v17 = vld [vmem:[%s1497_s6 + $0x168] sm:$0xff]  ;;  %v460_v18 = vld [vmem:[%s1497_s6 + $0x170] sm:$0xff]  ;;  %v461_v19 = vld [vmem:[%s1497_s6 + $0x178] sm:$0xff]  ;;  %s1238_s9 = scalar_lea.hbm %s1237_s30, 32  ;;  %p1243_p8 = scmp.lt.s32.totalorder %s1237_s30, %s1678_s5 }
  0x42   : > { %481 = vmatpush.msra.mxu0 %v462_v12  ;;  %501 = vmatpush.msra.mxu1 %v463_v13  ;;  %v454_v20 = vld [vmem:[%s1497_s6 + $0x140] sm:$0xff]  ;;  %v455_v21 = vld [vmem:[%s1497_s6 + $0x148] sm:$0xff]  ;;  %v456_v22 = vld [vmem:[%s1497_s6 + $0x150] sm:$0xff]  ;;  %p1239_p5 = scmp.ne.s32.totalorder %s1237_s30, %s1238_s9  ;;  %p1244_p9 = scmp.lt.s32.totalorder %s1242_s3, %s1238_s9 }
  0x43   : > { %521 = vmatpush.msra.mxu2 %v464_v14  ;;  %541 = vmatpush.msra.mxu3 %v465_v15  ;;  %v457_v23 = vld [vmem:[%s1497_s6 + $0x158] sm:$0xff]  ;;  %v450_v24 = vld [vmem:[%s1497_s6 + $0x120] sm:$0xff]  ;;  %v451_v25 = vld [vmem:[%s1497_s6 + $0x128] sm:$0xff] }
  0x44   : > { %482 = vmatpush.msra.mxu0 %v458_v16  ;;  %502 = vmatpush.msra.mxu1 %v459_v17  ;;  %v452_v26 = vld [vmem:[%s1497_s6 + $0x130] sm:$0xff]  ;;  %v453_v27 = vld [vmem:[%s1497_s6 + $0x138] sm:$0xff]  ;;  %v446_v28 = vld [vmem:[%s1497_s6 + $0x100] sm:$0xff]  ;;  %p1240_p6 = pnand %p1239_p5, %p1450_p13  ;;  %p1245_p10 = por %p1244_p9, %p1243_p8 }
  0x45   : > { %522 = vmatpush.msra.mxu2 %v460_v18  ;;  %542 = vmatpush.msra.mxu3 %v461_v19  ;;  %v447_v29 = vld [vmem:[%s1497_s6 + $0x108] sm:$0xff]  ;;  %v448_v30 = vld [vmem:[%s1497_s6 + $0x110] sm:$0xff]  ;;  %v449_v31 = vld [vmem:[%s1497_s6 + $0x118] sm:$0xff] }
  0x46   : > { %483 = vmatpush.msra.mxu0 %v454_v20  ;;  %503 = vmatpush.msra.mxu1 %v455_v21  ;;  %v442_v32 = vld [vmem:[%s1497_s6 + $0xe0] sm:$0xff]  ;;  %v443_v33 = vld [vmem:[%s1497_s6 + $0xe8] sm:$0xff]  ;;  %v444_v34 = vld [vmem:[%s1497_s6 + $0xf0] sm:$0xff]  ;;  %p1241_p7 = pneg %p1240_p6 }
  0x47   : > { %523 = vmatpush.msra.mxu2 %v456_v22  ;;  %543 = vmatpush.msra.mxu3 %v457_v23  ;;  %v445_v35 = vld [vmem:[%s1497_s6 + $0xf8] sm:$0xff]  ;;  %v438_v36 = vld [vmem:[%s1497_s6 + $0xc0] sm:$0xff]  ;;  %v439_v37 = vld [vmem:[%s1497_s6 + $0xc8] sm:$0xff] }
  0x48   : > { %484 = vmatpush.msra.mxu0 %v450_v24  ;;  %504 = vmatpush.msra.mxu1 %v451_v25  ;;  %v440_v38 = vld [vmem:[%s1497_s6 + $0xd0] sm:$0xff]  ;;  %v441_v39 = vld [vmem:[%s1497_s6 + $0xd8] sm:$0xff]  ;;  %v434_v40 = vld [vmem:[%s1497_s6 + $0xa0] sm:$0xff]  ;;  %p1246_p11 = pnand %p1245_p10, %p1241_p7 }
  0x49   : > { %524 = vmatpush.msra.mxu2 %v452_v26  ;;  %544 = vmatpush.msra.mxu3 %v453_v27  ;;  %v435_v41 = vld [vmem:[%s1497_s6 + $0xa8] sm:$0xff]  ;;  %v436_v42 = vld [vmem:[%s1497_s6 + $0xb0] sm:$0xff]  ;;  %v437_v43 = vld [vmem:[%s1497_s6 + $0xb8] sm:$0xff] }
  0x4a   : > { %485 = vmatpush.msra.mxu0 %v446_v28  ;;  %505 = vmatpush.msra.mxu1 %v447_v29  ;;  %v430_v44 = vld [vmem:[%s1497_s6 + $0x80] sm:$0xff]  ;;  %v431_v45 = vld [vmem:[%s1497_s6 + $0x88] sm:$0xff]  ;;  %v432_v46 = vld [vmem:[%s1497_s6 + $0x90] sm:$0xff] }
  0x4b   : > { %525 = vmatpush.msra.mxu2 %v448_v30  ;;  %545 = vmatpush.msra.mxu3 %v449_v31  ;;  %v433_v47 = vld [vmem:[%s1497_s6 + $0x98] sm:$0xff]  ;;  %v426_v48 = vld [vmem:[%s1497_s6 + $0x60] sm:$0xff]  ;;  %v427_v49 = vld [vmem:[%s1497_s6 + $0x68] sm:$0xff] }
  0x4c   : > { %486 = vmatpush.msra.mxu0 %v442_v32  ;;  %506 = vmatpush.msra.mxu1 %v443_v33  ;;  %v428_v50 = vld [vmem:[%s1497_s6 + $0x70] sm:$0xff]  ;;  %v429_v51 = vld [vmem:[%s1497_s6 + $0x78] sm:$0xff]  ;;  %v422_v52 = vld [vmem:[%s1497_s6 + $0x40] sm:$0xff] }
  0x4d   : > { %526 = vmatpush.msra.mxu2 %v444_v34  ;;  %546 = vmatpush.msra.mxu3 %v445_v35  ;;  %v423_v53 = vld [vmem:[%s1497_s6 + $0x48] sm:$0xff]  ;;  %v424_v54 = vld [vmem:[%s1497_s6 + $0x50] sm:$0xff]  ;;  %v425_v55 = vld [vmem:[%s1497_s6 + $0x58] sm:$0xff] }
  0x4e   : > { %487 = vmatpush.msra.mxu0 %v438_v36  ;;  %507 = vmatpush.msra.mxu1 %v439_v37  ;;  %v418_v56 = vld [vmem:[%s1497_s6 + $0x20] sm:$0xff]  ;;  %v419_v57 = vld [vmem:[%s1497_s6 + $0x28] sm:$0xff]  ;;  %v420_v58 = vld [vmem:[%s1497_s6 + $0x30] sm:$0xff] }
  0x4f   : > { %527 = vmatpush.msra.mxu2 %v440_v38  ;;  %547 = vmatpush.msra.mxu3 %v441_v39  ;;  %v421_v59 = vld [vmem:[%s1497_s6 + $0x38] sm:$0xff]  ;;  %v414_v60 = vld [vmem:[%s1497_s6] sm:$0xff]  ;;  %v415_v61 = vld [vmem:[%s1497_s6 + $0x8] sm:$0xff] }
  0x50   : > { %488 = vmatpush.msra.mxu0 %v434_v40  ;;  %508 = vmatpush.msra.mxu1 %v435_v41  ;;  %v416_v62 = vld [vmem:[%s1497_s6 + $0x10] sm:$0xff]  ;;  %v417_v63 = vld [vmem:[%s1497_s6 + $0x18] sm:$0xff]  ;;  %v573_v1 = vld [vmem:[%s332_s14] sm:$0xf] }
  0x51   : > { %528 = vmatpush.msra.mxu2 %v436_v42  ;;  %548 = vmatpush.msra.mxu3 %v437_v43  ;;  %v413_v0 = vld [vmem:[#allocation3] sm:$0xff]  ;;  %v575_v2 = vperm.slane %v573_v1, 0  ;;  %v576_v3 = vperm.slane %v573_v1, 1  ;;  %v577_v12 = vperm.slane %v573_v1, 2  ;;  %v578_v13 = vperm.slane %v573_v1, 3 }
  0x52   : > { %489 = vmatpush.msra.mxu0 %v430_v44  ;;  %509 = vmatpush.msra.mxu1 %v431_v45 }
  0x53   : > { %529 = vmatpush.msra.mxu2 %v432_v46  ;;  %549 = vmatpush.msra.mxu3 %v433_v47 }
  0x54   : > { %490 = vmatpush.msra.mxu0 %v426_v48  ;;  %510 = vmatpush.msra.mxu1 %v427_v49 }
  0x55   : > { %530 = vmatpush.msra.mxu2 %v428_v50  ;;  %550 = vmatpush.msra.mxu3 %v429_v51 }
  0x56   : > { %491 = vmatpush.msra.mxu0 %v422_v52  ;;  %511 = vmatpush.msra.mxu1 %v423_v53 }
  0x57   : > { %531 = vmatpush.msra.mxu2 %v424_v54  ;;  %551 = vmatpush.msra.mxu3 %v425_v55 }
  0x58   : > { %492 = vmatpush.msra.mxu0 %v418_v56  ;;  %512 = vmatpush.msra.mxu1 %v419_v57 }
  0x59   : > { %532 = vmatpush.msra.mxu2 %v420_v58  ;;  %552 = vmatpush.msra.mxu3 %v421_v59 }
  0x5a   : > { %493 = vmatpush.msra.mxu0 %v414_v60  ;;  %513 = vmatpush.msra.mxu1 %v415_v61 }
  0x5b   : > { %533 = vmatpush.msra.mxu2 %v416_v62  ;;  %553 = vmatpush.msra.mxu3 %v417_v63 }
  0x5c   : > { %494 = vmatmul.f32.vlgmr.msra.gmra.mxu0 %v413_v0  ;;  %514 = vmatmul.f32.vlgmr.msra.gmra.mxu1 %v413_v0 }
  0x5d   : > { %534 = vmatmul.f32.vlgmr.msra.gmra.mxu2 %v413_v0  ;;  %554 = vmatmul.f32.vlgmr.msra.gmra.mxu3 %v413_v0 }
  0xd9   : > { %v495_v4 = vpop.f32.mrf.mxu0  ;;  %v515_v5 = vpop.f32.mrf.mxu1 }
  0xda   : > { %v1578_v6 = vadd.f32 %v575_v2, %v495_v4  ;;  %v1580_v7 = vadd.f32 %v576_v3, %v515_v5 }
  0xdc   : > { %v587_v8 = vrot.slane %v1578_v6, 4  ;;  %v615_v9 = vmul.f32 %v1578_v6, %v1578_v6  ;;  %v593_v10 = vrot.slane %v1580_v7, 4  ;;  %v616_v11 = vmul.f32 %v1580_v7, %v1580_v7 }
  0xde   : > { %v588_v14 = vadd.f32 %v587_v8, %v1578_v6  ;;  %v619_v15 = vrot.slane %v615_v9, 4  ;;  %v594_v16 = vadd.f32 %v593_v10, %v1580_v7  ;;  %v625_v17 = vrot.slane %v616_v11, 4 }
  0xe0   : > { %v589_v18 = vrot.slane %v588_v14, 2  ;;  %v620_v19 = vadd.f32 %v619_v15, %v615_v9  ;;  %v595_v20 = vrot.slane %v594_v16, 2  ;;  %v626_v21 = vadd.f32 %v625_v17, %v616_v11  ;;  %v535_v22 = vpop.f32.mrf.mxu2  ;;  %v555_v23 = vpop.f32.mrf.mxu3 }
  0xe1   : > { %v1590_v24 = vadd.f32 %v577_v12, %v535_v22  ;;  %v1592_v25 = vadd.f32 %v578_v13, %v555_v23 }
  0xe2   : > { %v590_v26 = vadd.f32 %v589_v18, %v588_v14  ;;  %v621_v27 = vrot.slane %v620_v19, 2  ;;  %v596_v28 = vadd.f32 %v595_v20, %v594_v16  ;;  %v627_v29 = vrot.slane %v626_v21, 2 }
  0xe3   : > { %v599_v30 = vrot.slane %v1590_v24, 4  ;;  %v617_v31 = vmul.f32 %v1590_v24, %v1590_v24  ;;  %v605_v32 = vrot.slane %v1592_v25, 4  ;;  %v618_v33 = vmul.f32 %v1592_v25, %v1592_v25 }
  0xe4   : > { %v591_v34 = vrot.slane %v590_v26, 1  ;;  %v622_v35 = vadd.f32 %v621_v27, %v620_v19  ;;  %v597_v36 = vrot.slane %v596_v28, 1  ;;  %v628_v37 = vadd.f32 %v627_v29, %v626_v21 }
  0xe5   : > { %v600_v38 = vadd.f32 %v599_v30, %v1590_v24  ;;  %v631_v39 = vrot.slane %v617_v31, 4  ;;  %v606_v40 = vadd.f32 %v605_v32, %v1592_v25  ;;  %v637_v41 = vrot.slane %v618_v33, 4 }
  0xe6   : > { %v592_v42 = vadd.f32 %v591_v34, %v590_v26  ;;  %v623_v43 = vrot.slane %v622_v35, 1  ;;  %v598_v44 = vadd.f32 %v597_v36, %v596_v28  ;;  %v629_v45 = vrot.slane %v628_v37, 1 }
  0xe7   : > { %v601_v46 = vrot.slane %v600_v38, 2  ;;  %v632_v47 = vadd.f32 %v631_v39, %v617_v31  ;;  %v607_v48 = vrot.slane %v606_v40, 2  ;;  %v638_v49 = vadd.f32 %v637_v41, %v618_v33 }
  0xe8   : > { %v1602_v50 = vmul.f32 0.125, %v592_v42  ;;  %v624_v51 = vadd.f32 %v623_v43, %v622_v35  ;;  %v1604_v52 = vmul.f32 0.125, %v598_v44  ;;  %v630_v53 = vadd.f32 %v629_v45, %v628_v37 }
  0xe9   : > { %v602_v54 = vadd.f32 %v601_v46, %v600_v38  ;;  %v633_v55 = vrot.slane %v632_v47, 2  ;;  %v608_v56 = vadd.f32 %v607_v48, %v606_v40  ;;  %v639_v57 = vrot.slane %v638_v49, 2 }
  0xea   : > { %v643_v58 = vmul.f32 0.125, %v624_v51  ;;  %v647_v59 = vmul.f32 %v1602_v50, %v1602_v50  ;;  %v644_v60 = vmul.f32 0.125, %v630_v53  ;;  %v648_v61 = vmul.f32 %v1604_v52, %v1604_v52 }
  0xeb   : > { %v603_v62 = vrot.slane %v602_v54, 1  ;;  %v634_v63 = vadd.f32 %v633_v55, %v632_v47  ;;  %v609_v0 = vrot.slane %v608_v56, 1  ;;  %v640_v1 = vadd.f32 %v639_v57, %v638_v49 }
  0xec   : > { %v651_v2 = vsub.f32 %v643_v58, %v647_v59  ;;  %v652_v3 = vsub.f32 %v644_v60, %v648_v61  ;;  %v655_v58 = vld [vmem:[%s342_s26] sm:$0xf] }
  0xed   : > { %v604_v4 = vadd.f32 %v603_v62, %v602_v54  ;;  %v635_v5 = vrot.slane %v634_v63, 1  ;;  %v610_v8 = vadd.f32 %v609_v0, %v608_v56  ;;  %v641_v9 = vrot.slane %v640_v1, 1 }
  0xee   : > { %v656_v10 = vadd.f32 1e-05, %v651_v2  ;;  %v657_v11 = vadd.f32 1e-05, %v652_v3 }
  0xef   : > { %v1610_v12 = vmul.f32 0.125, %v604_v4  ;;  %v636_v13 = vadd.f32 %v635_v5, %v634_v63  ;;  %v1612_v14 = vmul.f32 0.125, %v610_v8  ;;  %v642_v15 = vadd.f32 %v641_v9, %v640_v1 }
  0xf0   : > { %1064 = vrsqrt.f32 %v656_v10  ;;  %vm676_vm1 = vweird.f32 %v657_v11  ;;  %vm666_vm11 = vweird.f32 %v656_v10 }
  0xf1   : > { %1066 = vrsqrt.f32 %v657_v11  ;;  %v645_v16 = vmul.f32 0.125, %v636_v13  ;;  %v649_v17 = vmul.f32 %v1610_v12, %v1610_v12  ;;  %v646_v18 = vmul.f32 0.125, %v642_v15  ;;  %v715_v15 = vld [vmem:[%s352_s27] sm:$0xf] }
  0xf2   : > { %v650_v19 = vmul.f32 %v1612_v14, %v1612_v14 }
  0xf3   : > { %v653_v20 = vsub.f32 %v645_v16, %v649_v17 }
  0xf4   : > { %v654_v21 = vsub.f32 %v646_v18, %v650_v19 }
  0xf5   : > { %v658_v22 = vadd.f32 1e-05, %v653_v20 }
  0xf6   : > { %v1065_v23 = vpop.eup %1064  ;;  %v659_v26 = vadd.f32 1e-05, %v654_v21 }
  0xf7   : > { %v1067_v27 = vpop.eup %1066  ;;  %v661_v28 = vmul.f32 %v1065_v23, %v656_v10  ;;  %1068 = vrsqrt.f32 %v658_v22  ;;  %vm686_vm5 = vweird.f32 %v658_v22  ;;  %vm667_vm6 = vweird.f32 %v1065_v23 }
  0xf8   : > { %v671_v29 = vmul.f32 %v1067_v27, %v657_v11  ;;  %1070 = vrsqrt.f32 %v659_v26  ;;  %vm677_vm0 = vweird.f32 %v1067_v27  ;;  %vm696_vm8 = vweird.f32 %v659_v26  ;;  %vm668_vm13 = vmor %vm666_vm11, %vm667_vm6 }
  0xf9   : > { %v662_v31 = vmul.f32 %v1065_v23, %v661_v28  ;;  %vm678_vm2 = vmor %vm676_vm1, %vm677_vm0 }
  0xfa   : > { %v672_v30 = vmul.f32 %v1067_v27, %v671_v29 }
  0xfb   : > { %v663_v37 = vmul.f32 0.5, %v662_v31 }
  0xfc   : > { %v673_v32 = vmul.f32 0.5, %v672_v30 }
  0xfd   : > { %v1069_v33 = vpop.eup %1068  ;;  %v664_v43 = vsub.f32 1.5, %v663_v37 }
  0xfe   : > { %v1071_v34 = vpop.eup %1070  ;;  %v674_v35 = vsub.f32 1.5, %v673_v32  ;;  %v681_v36 = vmul.f32 %v1069_v33, %v658_v22  ;;  %vm687_vm3 = vweird.f32 %v1069_v33 }
  0xff   : > { %v691_v38 = vmul.f32 %v1071_v34, %v659_v26  ;;  %vm697_vm4 = vweird.f32 %v1071_v34  ;;  %v665_v49 = vmul.f32 %v1065_v23, %v664_v43  ;;  %vm688_vm7 = vmor %vm686_vm5, %vm687_vm3 }
 0x100   : > { %v682_v39 = vmul.f32 %v1069_v33, %v681_v36  ;;  %v675_v40 = vmul.f32 %v1067_v27, %v674_v35  ;;  %vm698_vm9 = vmor %vm696_vm8, %vm697_vm4 }
 0x101   : > { %v692_v41 = vmul.f32 %v1071_v34, %v691_v38  ;;  %v669_v59 = vsel %vm668_vm13, %v1065_v23, %v665_v49 }
 0x102   : > { %v683_v42 = vmul.f32 0.5, %v682_v39  ;;  %v679_v46 = vsel %vm678_vm2, %v1067_v27, %v675_v40 }
 0x103   : > { %v693_v44 = vmul.f32 0.5, %v692_v41  ;;  %v704_v53 = vrot.slane %v679_v46, 7 }
 0x104   : > { %v684_v45 = vsub.f32 1.5, %v683_v42 }
 0x105   : > { %v694_v47 = vsub.f32 1.5, %v693_v44  ;;  %v708_v60 = vsel %vm707_vm10, %v669_v59, %v704_v53 }
 0x106   : > { %v685_v48 = vmul.f32 %v1069_v33, %v684_v45 }
 0x107   : > { %v695_v51 = vmul.f32 %v1071_v34, %v694_v47 }
 0x108   : > { %v689_v54 = vsel %vm688_vm7, %v1069_v33, %v685_v48 }
 0x109   : > { %v705_v55 = vrot.slane %v689_v54, 6  ;;  %v699_v56 = vsel %vm698_vm9, %v1071_v34, %v695_v51 }
 0x10a   : > { %v706_v57 = vrot.slane %v699_v56, 5 }
 0x10c   : > { %v710_v61 = vsel %vm709_vm12, %v705_v55, %v706_v57 }
 0x10d   : > { %v712_v62 = vsel %vm711_vm14, %v708_v60, %v710_v61 }
 0x10e   : > { %v714_v63 = vmul.f32 %v712_v62, %v655_v58 }
 0x110   : > { %v717_v0 = vperm.slane %v714_v63, 0  ;;  %v718_v1 = vperm.slane %v714_v63, 1  ;;  %v719_v2 = vperm.slane %v714_v63, 2  ;;  %v720_v3 = vperm.slane %v714_v63, 3 }
 0x112   : > { %v726_v4 = vmul.f32 %v718_v1, %v1604_v52  ;;  %v727_v5 = vmul.f32 %v719_v2, %v1610_v12  ;;  %v728_v8 = vmul.f32 %v720_v3, %v1612_v14  ;;  %v725_v9 = vmul.f32 %v717_v0, %v1602_v50 }
 0x113   : > { %v744_v12 = vmul.f32 %v720_v3, %v1592_v25  ;;  %v741_v14 = vmul.f32 %v717_v0, %v1578_v6  ;;  %v742_v19 = vmul.f32 %v718_v1, %v1580_v7  ;;  %v743_v50 = vmul.f32 %v719_v2, %v1590_v24 }
 0x114   : > { %v733_v10 = vrot.slane %v726_v4, 7  ;;  %v734_v11 = vrot.slane %v727_v5, 6  ;;  %v735_v13 = vrot.slane %v728_v8, 5 }
 0x116   : > { %v736_v16 = vsel %vm707_vm10, %v725_v9, %v733_v10  ;;  %v737_v17 = vsel %vm709_vm12, %v734_v11, %v735_v13 }
 0x117   : > { %v738_v18 = vsel %vm711_vm14, %v736_v16, %v737_v17 }
 0x118   : > { %v740_v52 = vsub.f32 %v715_v15, %v738_v18 }
 0x11a   : > { %v749_v20 = vperm.slane %v740_v52, 3  ;;  %v746_v21 = vperm.slane %v740_v52, 0  ;;  %v747_v22 = vperm.slane %v740_v52, 1  ;;  %v748_v23 = vperm.slane %v740_v52, 2 }
 0x11c   : > { %v757_v26 = vadd.f32 %v749_v20, %v744_v12  ;;  %v754_v27 = vadd.f32 %v746_v21, %v741_v14  ;;  %v755_v28 = vadd.f32 %v747_v22, %v742_v19  ;;  %v756_v29 = vadd.f32 %v748_v23, %v743_v50 }
 0x11e   : > { %v761_v25 = vmul.f32 0.2, %v757_v26  ;;  %v758_v6 = vmul.f32 0.2, %v754_v27  ;;  %v759_v7 = vmul.f32 0.2, %v755_v28 }
 0x11f   : > { %v760_v30 = vmul.f32 0.2, %v756_v29 }
 0x120   : > { %v762_v24 = vmax.f32 %v754_v27, %v758_v6  ;;  %v763_v31 = vmax.f32 %v755_v28, %v759_v7  ;;  %v765_v32 = vmax.f32 %v757_v26, %v761_v25 }
 0x121   : > { %v764_v33 = vmax.f32 %v756_v29, %v760_v30 }
 0x122   : > { %766 = vst [vmem:[%s394_s10] sm:$0xff] %v762_v24 }
 0x123   : > { %767 = vst [vmem:[%s394_s10 + $0x8] sm:$0xff] %v763_v31 }
 0x124   : > { %768 = vst [vmem:[%s394_s10 + $0x10] sm:$0xff] %v764_v33 }
 0x125   : > { %769 = vst [vmem:[%s394_s10 + $0x18] sm:$0xff] %v765_v32 }
 0x126   : > { %1249 = shalt.err (!%p1246_p11)
}
 0x127   : > { %985 = dma.vmem_to_hbm [thread:$0]  (%p1450_p13), %s785_s13, 512, %s787_s25, %s771_s21  }
 0x128 PF: > { %p1011_p12 = scmp.ge.s32.totalorder %s1312_s23, 2  ;;  %s798_s1 = sand.u32 1, %s1292_s18  }
 0x129   : > { %s799_s22 = scalar_lea.sflag [#allocation5], %s798_s1 }
 0x12a   : > { %p1005_p2 = pnand %p1011_p12, %p1454_p0 }
 0x12c   : > { %p1006_p3 = pneg %p1005_p2 }
 0x12e   : > { %1287 = dma.done.wait (%p1006_p3), %s799_s22, 512  }
 0x12f   : > { %1289 = vsyncadd (%p1006_p3), %s799_s22, 4294966784  ;;  %s25_s23 = sadd.s32 1, %s1312_s23   ;;  %s1696_s14 = sld [smem:[#allocation19_spill]] }
 0x130   : > { %p22_p1 = scmp.ge.s32.totalorder %s25_s23, 10   ;;  %s1697_s21 = sld [smem:[#allocation17_spill]] }
 0x131   : > { %s1698_s22 = sld [smem:[#allocation18_spill]]  ;;  %s1699_s18 = smov %s1296_s19 }
 0x132   : > { %s1700_s19 = smov %s1300_s20  ;;  %24 = sbr.rel (!%p22_p1) target bundleno = 13 (0xd), region = 134 }
 0x135   : > { %s1701_s20 = smov %s1696_s14 }
 0x137   :  { %805 = vsyncpa [#allocation4], 1 }
 0x138   :  { %807 = vsyncpa [#allocation4 + $0x1], 1 }
 0x139   :  { %808 = vsyncpa [#allocation7], 1 }
 0x13a   :  { %810 = vsyncpa [#allocation7 + $0x1], 1 }
 0x13b   :  { %811 = vsyncpa [#allocation10], 1 }
 0x13c   :  { %813 = vsyncpa [#allocation10 + $0x1], 1 }
 0x13d   :  { %814 = vsyncpa [#allocation5], 1 }
 0x13e   :  { %816 = vsyncpa [#allocation5 + $0x1], 1 }

</bundles_post_ra>
